<compile_context>
chip_gen: v6e
topology: v6e:2x2x1
jax: 0.10.0
libtpu: 0.0.40
codegen_flags: <defaults>
</compile_context>

<pallas_src>
import functools

import jax
import jax.numpy as jnp
from jax import lax
from jax.experimental import pallas as pl
from jax.experimental.pallas import tpu as pltpu


def _mf_encoder_kernel(xr_ref, xh_ref, xl_ref, w_ref, b_ref, o_ref,
                       patches_ref, *, c, H, W):
    """One batch element (one grid step) of MFPlainEncoder_single.

    xr/xh/xl refs : (1, c, H*W)  activations (compute dtype), spatial on lanes.
    w_ref         : (c, 12c)     [w_eff | w3f] in the compute dtype, where
                    w_eff = w1 @ w_mf (folded 1x1s) and w3f is the 3x3 weight
                    flattened as (co, (kh, kw, ci)).
    b_ref         : (c, 2)       [b_eff | b3], f32.
    o_ref         : (1, c, H*W)
    patches_ref   : VMEM scratch (9c, H*W) im2col matrix (compute dtype).
    """
    HW = H * W
    f32 = jnp.float32
    cdt = patches_ref.dtype

    xr = xr_ref[0]                      # (c, HW)
    xh = xh_ref[0]
    xl = xl_ref[0]

    w_eff = w_ref[:, :3 * c]            # (c, 3c)
    w3f = w_ref[:, 3 * c:]              # (c, 9c)
    b_eff = b_ref[:, 0:1]               # (c, 1) f32
    b3 = b_ref[:, 1:2]                  # (c, 1) f32

    # ---- fused (conv1x1 o mf_conv): single K=3c MXU dot, f32 accumulation ----
    x_cat = jnp.concatenate([xr, xh, xl], axis=0)                       # (3c, HW)
    h1 = jnp.dot(w_eff, x_cat, preferred_element_type=f32) + b_eff      # (c, HW) f32

    # ---- conv3x3, reflect padding, as im2col ----
    pix = lax.broadcasted_iota(jnp.int32, (c, HW), 1)
    col = pix % W
    first_col = col == 0
    last_col = col == (W - 1)
    first_row = pix < W
    last_row = pix >= (H - 1) * W

    # Row (+-W) shifts as XLU rotates; the wrapped rows are exactly the border
    # rows, which the reflect selects overwrite.
    rot_pw = pltpu.roll(h1, W, axis=1)          # [k] = h1[k - W]  (row r-1)
    rot_mw = pltpu.roll(h1, HW - W, axis=1)     # [k] = h1[k + W]  (row r+1)
    up = jnp.where(first_row, rot_mw, rot_pw)   # kh = 0 (reflect row -1 -> 1)
    down = jnp.where(last_row, rot_pw, rot_mw)  # kh = 2 (reflect row H -> H-2)

    # Write each tap straight into the VMEM scratch so only one tap is live in
    # vregs at a time; then a single K=9c dot over the whole patch matrix.
    for t, hv in enumerate((up, h1, down)):     # kh = 0, 1, 2
        rot_p1 = pltpu.roll(hv, 1, axis=1)      # [k] = hv[k - 1]
        rot_m1 = pltpu.roll(hv, HW - 1, axis=1)  # [k] = hv[k + 1]
        base = 3 * t * c
        # kw = 0 : col-1, reflect col -1 -> col 1
        patches_ref[base:base + c, :] = (
            jnp.where(first_col, rot_m1, rot_p1).astype(cdt))
        # kw = 1 : center
        patches_ref[base + c:base + 2 * c, :] = hv.astype(cdt)
        # kw = 2 : col+1, reflect col W -> col W-2
        patches_ref[base + 2 * c:base + 3 * c, :] = (
            jnp.where(last_col, rot_p1, rot_m1).astype(cdt))

    h2 = jnp.dot(w3f, patches_ref[...], preferred_element_type=f32) + b3  # (c, HW)

    # ---- ReLU + residual (elementwise tail kept in f32) ----
    o_ref[0] = (xr.astype(f32) + jnp.maximum(h2, 0.0)).astype(o_ref.dtype)


def mf_plain_encoder_single(x_rgb, x_hsv, x_lab, params, *,
                            compute_dtype=jnp.float32):
    """MFPlainEncoder_single.forward. Inputs NCHW (N, c, H, W), returns same."""
    N, c, H, W = x_rgb.shape
    assert H >= 2 and W >= 2, "reflect-pad 3x3 needs H, W >= 2"
    HW = H * W
    out_dtype = x_rgb.dtype
    f32 = jnp.float32

    # Contiguous reshapes only; optional cast to the MXU compute dtype.
    xr = x_rgb.reshape(N, c, HW).astype(compute_dtype)
    xh = x_hsv.reshape(N, c, HW).astype(compute_dtype)
    xl = x_lab.reshape(N, c, HW).astype(compute_dtype)

    # ---- one-off weight prep (tiny) ----
    wmf = params["w_mf"].reshape(c, 3 * c).astype(f32)
    bmf = params["b_mf"].reshape(c).astype(f32)
    w1 = params["w1"].reshape(c, c).astype(f32)
    b1 = params["b1"].reshape(c).astype(f32)
    # Fold mf_conv and rgb_conv.conv1x1 (exact: no nonlinearity between them).
    w_eff = w1 @ wmf                              # (c, 3c)
    b_eff = w1 @ bmf + b1                         # (c,)
    # (co, ci, kh, kw) -> (co, (kh, kw, ci)) to match the in-kernel tap order.
    w3f = jnp.transpose(params["w3"].astype(f32), (0, 2, 3, 1)).reshape(c, 9 * c)
    b3 = params["b3"].reshape(c).astype(f32)

    # Pack the tiny weight/bias operands into two slabs (two DMAs, not six).
    wslab = jnp.concatenate([w_eff, w3f], axis=1).astype(compute_dtype)  # (c, 12c)
    bslab = jnp.stack([b_eff, b3], axis=1).astype(f32)                   # (c, 2)

    kernel = functools.partial(_mf_encoder_kernel, c=c, H=H, W=W)
    img_spec = pl.BlockSpec((1, c, HW), lambda n: (n, 0, 0))

    out = pl.pallas_call(
        kernel,
        out_shape=jax.ShapeDtypeStruct((N, c, HW), out_dtype),
        grid_spec=pltpu.PrefetchScalarGridSpec(
            num_scalar_prefetch=0,
            grid=(N,),          # pipelined over batch; "parallel" -> 2 TCs on v7x
            in_specs=[
                img_spec, img_spec, img_spec,
                pl.BlockSpec((c, 12 * c), lambda n: (0, 0)),
                pl.BlockSpec((c, 2), lambda n: (0, 0)),
            ],
            out_specs=img_spec,
            scratch_shapes=[pltpu.VMEM((9 * c, HW), compute_dtype)],
        ),
        compiler_params=pltpu.CompilerParams(
            dimension_semantics=("parallel",)),
        # TODO(synk): for production H*W, add a spatial row-tile grid axis with
        # a 1-row halo and raise vmem_limit_bytes per generation.
    )(xr, xh, xl, wslab, bslab)

    return out.reshape(N, c, H, W)


if __name__ == "__main__":
    key = jax.random.PRNGKey(0)
    keys = jax.random.split(key, 9)
    N, c, H, W = 2, 4, 16, 16

    x_rgb = jax.random.normal(keys[0], (N, c, H, W), dtype=jnp.float32)
    x_hsv = jax.random.normal(keys[1], (N, c, H, W), dtype=jnp.float32)
    x_lab = jax.random.normal(keys[2], (N, c, H, W), dtype=jnp.float32)

    def init(k, shape, fan_in):
        return jax.random.normal(k, shape, dtype=jnp.float32) * (1.0 / fan_in ** 0.5)

    params = {
        "w_mf": init(keys[3], (c, 3 * c, 1, 1), 3 * c),   # mf_conv
        "b_mf": init(keys[4], (c,), 3 * c),
        "w1": init(keys[5], (c, c, 1, 1), c),             # rgb_conv.conv1x1
        "b1": init(keys[6], (c,), c),
        "w3": init(keys[7], (c, c, 3, 3), 9 * c),         # rgb_conv.conv3x3
        "b3": init(keys[8], (c,), 9 * c),
    }

    # Pure-JAX reference mirroring the PyTorch module.
    dn = ("NCHW", "OIHW", "NCHW")
    cat = jnp.concatenate([x_rgb, x_hsv, x_lab], axis=1)
    agg = lax.conv_general_dilated(cat, params["w_mf"], (1, 1), "VALID",
                                   dimension_numbers=dn) \
        + params["b_mf"][None, :, None, None]
    h1 = lax.conv_general_dilated(agg, params["w1"], (1, 1), "VALID",
                                  dimension_numbers=dn) \
        + params["b1"][None, :, None, None]
    h1p = jnp.pad(h1, ((0, 0), (0, 0), (1, 1), (1, 1)), mode="reflect")
    h2 = lax.conv_general_dilated(h1p, params["w3"], (1, 1), "VALID",
                                  dimension_numbers=dn) \
        + params["b3"][None, :, None, None]
    ref = x_rgb + jnp.maximum(h2, 0.0)

    # f32 path: exact vs. the module.
    run_f32 = jax.jit(functools.partial(mf_plain_encoder_single,
                                        compute_dtype=jnp.float32))
    out = jax.block_until_ready(run_f32(x_rgb, x_hsv, x_lab, params))
    assert out.shape == (N, c, H, W), out.shape
    err_f32 = float(jnp.max(jnp.abs(out - ref)))
    assert jnp.allclose(out, ref, atol=1e-4, rtol=1e-4), err_f32

    # bf16 MXU path (recommended on v5e/v6e/v7x): bf16 dots, f32 accumulation,
    # f32 elementwise tail. Looser tolerance for the bf16 rounding.
    run_bf16 = jax.jit(functools.partial(mf_plain_encoder_single,
                                         compute_dtype=jnp.bfloat16))
    out_bf16 = jax.block_until_ready(run_bf16(x_rgb, x_hsv, x_lab, params))
    err_bf16 = float(jnp.max(jnp.abs(out_bf16 - ref)))
    assert jnp.allclose(out_bf16, ref, atol=1e-1, rtol=1e-1), err_bf16

    print("KERNEL_OK")
</pallas_src>

<mosaic_0001>
module attributes {stable_mosaic.version = 11 : i64} {
  func.func @_mf_encoder_kernel(%arg0: i32, %arg1: memref<1x4x256xf32, #tpu.memory_space<vmem>>, %arg2: memref<1x4x256xf32, #tpu.memory_space<vmem>>, %arg3: memref<1x4x256xf32, #tpu.memory_space<vmem>>, %arg4: memref<4x48xf32, #tpu.memory_space<vmem>>, %arg5: memref<4x2xf32, #tpu.memory_space<vmem>>, %arg6: memref<1x4x256xf32, #tpu.memory_space<vmem>>, %arg7: memref<36x256xf32, #tpu.memory_space<vmem>>) attributes {dimension_semantics = [#tpu.dimension_semantics<parallel>], iteration_bounds = array<i64: 2>, scalar_prefetch = 0 : i64, scratch_operands = 1 : i64, tpu.core_type = #tpu.core_type<tc>, window_params = [{transform_indices = @transform_0, window_bounds = array<i64: 1, 4, 256>}, {transform_indices = @transform_1, window_bounds = array<i64: 1, 4, 256>}, {transform_indices = @transform_2, window_bounds = array<i64: 1, 4, 256>}, {pipeline_mode = #tpu.pipeline_mode<synchronous>, transform_indices = @transform_3, window_bounds = array<i64: 4, 48>}, {pipeline_mode = #tpu.pipeline_mode<synchronous>, transform_indices = @transform_4, window_bounds = array<i64: 4, 2>}, {transform_indices = @transform_5, window_bounds = array<i64: 1, 4, 256>}]} {
    %c0 = arith.constant 0 : index
    %c0_0 = arith.constant 0 : index
    %c0_1 = arith.constant 0 : index
    %0 = vector.load %arg1[%c0, %c0_0, %c0_1] : memref<1x4x256xf32, #tpu.memory_space<vmem>>, vector<1x4x256xf32>
    %1 = vector.shape_cast %0 : vector<1x4x256xf32> to vector<4x256xf32>
    %c0_2 = arith.constant 0 : index
    %c0_3 = arith.constant 0 : index
    %c0_4 = arith.constant 0 : index
    %2 = vector.load %arg2[%c0_2, %c0_3, %c0_4] : memref<1x4x256xf32, #tpu.memory_space<vmem>>, vector<1x4x256xf32>
    %3 = vector.shape_cast %2 : vector<1x4x256xf32> to vector<4x256xf32>
    %c0_5 = arith.constant 0 : index
    %c0_6 = arith.constant 0 : index
    %c0_7 = arith.constant 0 : index
    %4 = vector.load %arg3[%c0_5, %c0_6, %c0_7] : memref<1x4x256xf32, #tpu.memory_space<vmem>>, vector<1x4x256xf32>
    %5 = vector.shape_cast %4 : vector<1x4x256xf32> to vector<4x256xf32>
    %c0_8 = arith.constant 0 : index
    %c0_9 = arith.constant 0 : index
    %6 = vector.load %arg4[%c0_8, %c0_9] : memref<4x48xf32, #tpu.memory_space<vmem>>, vector<4x12xf32>
    %c0_10 = arith.constant 0 : index
    %c12 = arith.constant 12 : index
    %7 = vector.load %arg4[%c0_10, %c12] : memref<4x48xf32, #tpu.memory_space<vmem>>, vector<4x36xf32>
    %c0_11 = arith.constant 0 : index
    %c0_12 = arith.constant 0 : index
    %8 = vector.load %arg5[%c0_11, %c0_12] : memref<4x2xf32, #tpu.memory_space<vmem>>, vector<4x1xf32>
    %c0_13 = arith.constant 0 : index
    %c1 = arith.constant 1 : index
    %9 = vector.load %arg5[%c0_13, %c1] : memref<4x2xf32, #tpu.memory_space<vmem>>, vector<4x1xf32>
    %10 = tpu.concatenate %1, %3, %5 in 0 : vector<4x256xf32>, vector<4x256xf32>, vector<4x256xf32> -> vector<12x256xf32>
    %cst = arith.constant dense<0.000000e+00> : vector<4x256xf32>
    %11 = tpu.matmul %6, %10, %cst {dimension_numbers = #tpu.dot_dimension_numbers<[1], [0], [0], [1], [0, 0, 1, 1], [], []>} : vector<4x12xf32>, vector<12x256xf32>, vector<4x256xf32> -> vector<4x256xf32>
    %12 = vector.broadcast %8 : vector<4x1xf32> to vector<4x256xf32>
    %13 = arith.addf %11, %12 : vector<4x256xf32>
    %14 = tpu.iota {dimensions = array<i32: 1>} : vector<4x256xi32>
    %c16_i32 = arith.constant 16 : i32
    %c0_i32 = arith.constant 0 : i32
    %15 = arith.cmpi eq, %c16_i32, %c0_i32 : i32
    %c1_i32 = arith.constant 1 : i32
    %16 = arith.select %15, %c1_i32, %c16_i32 : i32
    %17 = vector.broadcast %16 : i32 to vector<4x256xi32>
    %18 = arith.remsi %14, %17 : vector<4x256xi32>
    %c0_i32_14 = arith.constant 0 : i32
    %19 = vector.broadcast %c0_i32_14 : i32 to vector<4x256xi32>
    %20 = arith.cmpi ne, %18, %19 : vector<4x256xi32>
    %c0_i32_15 = arith.constant 0 : i32
    %21 = vector.broadcast %c0_i32_15 : i32 to vector<4x256xi32>
    %22 = arith.cmpi slt, %18, %21 : vector<4x256xi32>
    %c0_i32_16 = arith.constant 0 : i32
    %23 = arith.cmpi slt, %16, %c0_i32_16 : i32
    %24 = vector.broadcast %23 : i1 to vector<4x256xi1>
    %25 = vector.broadcast %24 : vector<4x256xi1> to vector<4x256xi1>
    %26 = arith.xori %22, %25 : vector<4x256xi1>
    %27 = arith.andi %26, %20 : vector<4x256xi1>
    %28 = vector.broadcast %16 : i32 to vector<4x256xi32>
    %29 = arith.addi %18, %28 : vector<4x256xi32>
    %30 = arith.select %27, %29, %18 : vector<4x256xi1>, vector<4x256xi32>
    %c0_i32_17 = arith.constant 0 : i32
    %31 = vector.broadcast %c0_i32_17 : i32 to vector<4x256xi32>
    %32 = arith.cmpi eq, %30, %31 : vector<4x256xi32>
    %c15_i32 = arith.constant 15 : i32
    %33 = vector.broadcast %c15_i32 : i32 to vector<4x256xi32>
    %34 = arith.cmpi eq, %30, %33 : vector<4x256xi32>
    %c16_i32_18 = arith.constant 16 : i32
    %35 = vector.broadcast %c16_i32_18 : i32 to vector<4x256xi32>
    %36 = arith.cmpi slt, %14, %35 : vector<4x256xi32>
    %c240_i32 = arith.constant 240 : i32
    %37 = vector.broadcast %c240_i32 : i32 to vector<4x256xi32>
    %38 = arith.cmpi sge, %14, %37 : vector<4x256xi32>
    %c16_i32_19 = arith.constant 16 : i32
    %39 = tpu.dynamic_rotate %13 by %c16_i32_19 dim 1 : vector<4x256xf32>, i32 -> vector<4x256xf32>
    %c240_i32_20 = arith.constant 240 : i32
    %40 = tpu.dynamic_rotate %13 by %c240_i32_20 dim 1 : vector<4x256xf32>, i32 -> vector<4x256xf32>
    %41 = arith.select %36, %40, %39 : vector<4x256xi1>, vector<4x256xf32>
    %42 = arith.select %38, %39, %40 : vector<4x256xi1>, vector<4x256xf32>
    %c1_i32_21 = arith.constant 1 : i32
    %43 = tpu.dynamic_rotate %41 by %c1_i32_21 dim 1 : vector<4x256xf32>, i32 -> vector<4x256xf32>
    %c255_i32 = arith.constant 255 : i32
    %44 = tpu.dynamic_rotate %41 by %c255_i32 dim 1 : vector<4x256xf32>, i32 -> vector<4x256xf32>
    %45 = arith.select %32, %44, %43 : vector<4x256xi1>, vector<4x256xf32>
    %c0_22 = arith.constant 0 : index
    %c0_23 = arith.constant 0 : index
    %46 = vector.load %arg7[%c0_22, %c0_23] : memref<36x256xf32, #tpu.memory_space<vmem>>, vector<4x256xf32>
    tpu.vector_store %arg7[%c0_22, %c0_23], %45 {strides = array<i32>} : memref<36x256xf32, #tpu.memory_space<vmem>>, vector<4x256xf32>,
    %c4 = arith.constant 4 : index
    %c0_24 = arith.constant 0 : index
    %47 = vector.load %arg7[%c4, %c0_24] : memref<36x256xf32, #tpu.memory_space<vmem>>, vector<4x256xf32>
    tpu.vector_store %arg7[%c4, %c0_24], %41 {strides = array<i32>} : memref<36x256xf32, #tpu.memory_space<vmem>>, vector<4x256xf32>,
    %48 = arith.select %34, %43, %44 : vector<4x256xi1>, vector<4x256xf32>
    %c8 = arith.constant 8 : index
    %c0_25 = arith.constant 0 : index
    %49 = vector.load %arg7[%c8, %c0_25] : memref<36x256xf32, #tpu.memory_space<vmem>>, vector<4x256xf32>
    tpu.vector_store %arg7[%c8, %c0_25], %48 {strides = array<i32>} : memref<36x256xf32, #tpu.memory_space<vmem>>, vector<4x256xf32>,
    %c1_i32_26 = arith.constant 1 : i32
    %50 = tpu.dynamic_rotate %13 by %c1_i32_26 dim 1 : vector<4x256xf32>, i32 -> vector<4x256xf32>
    %c255_i32_27 = arith.constant 255 : i32
    %51 = tpu.dynamic_rotate %13 by %c255_i32_27 dim 1 : vector<4x256xf32>, i32 -> vector<4x256xf32>
    %52 = arith.select %32, %51, %50 : vector<4x256xi1>, vector<4x256xf32>
    %c12_28 = arith.constant 12 : index
    %c0_29 = arith.constant 0 : index
    %53 = vector.load %arg7[%c12_28, %c0_29] : memref<36x256xf32, #tpu.memory_space<vmem>>, vector<4x256xf32>
    tpu.vector_store %arg7[%c12_28, %c0_29], %52 {strides = array<i32>} : memref<36x256xf32, #tpu.memory_space<vmem>>, vector<4x256xf32>,
    %c16 = arith.constant 16 : index
    %c0_30 = arith.constant 0 : index
    %54 = vector.load %arg7[%c16, %c0_30] : memref<36x256xf32, #tpu.memory_space<vmem>>, vector<4x256xf32>
    tpu.vector_store %arg7[%c16, %c0_30], %13 {strides = array<i32>} : memref<36x256xf32, #tpu.memory_space<vmem>>, vector<4x256xf32>,
    %55 = arith.select %34, %50, %51 : vector<4x256xi1>, vector<4x256xf32>
    %c20 = arith.constant 20 : index
    %c0_31 = arith.constant 0 : index
    %56 = vector.load %arg7[%c20, %c0_31] : memref<36x256xf32, #tpu.memory_space<vmem>>, vector<4x256xf32>
    tpu.vector_store %arg7[%c20, %c0_31], %55 {strides = array<i32>} : memref<36x256xf32, #tpu.memory_space<vmem>>, vector<4x256xf32>,
    %c1_i32_32 = arith.constant 1 : i32
    %57 = tpu.dynamic_rotate %42 by %c1_i32_32 dim 1 : vector<4x256xf32>, i32 -> vector<4x256xf32>
    %c255_i32_33 = arith.constant 255 : i32
    %58 = tpu.dynamic_rotate %42 by %c255_i32_33 dim 1 : vector<4x256xf32>, i32 -> vector<4x256xf32>
    %59 = arith.select %32, %58, %57 : vector<4x256xi1>, vector<4x256xf32>
    %c24 = arith.constant 24 : index
    %c0_34 = arith.constant 0 : index
    %60 = vector.load %arg7[%c24, %c0_34] : memref<36x256xf32, #tpu.memory_space<vmem>>, vector<4x256xf32>
    tpu.vector_store %arg7[%c24, %c0_34], %59 {strides = array<i32>} : memref<36x256xf32, #tpu.memory_space<vmem>>, vector<4x256xf32>,
    %c28 = arith.constant 28 : index
    %c0_35 = arith.constant 0 : index
    %61 = vector.load %arg7[%c28, %c0_35] : memref<36x256xf32, #tpu.memory_space<vmem>>, vector<4x256xf32>
    tpu.vector_store %arg7[%c28, %c0_35], %42 {strides = array<i32>} : memref<36x256xf32, #tpu.memory_space<vmem>>, vector<4x256xf32>,
    %62 = arith.select %34, %57, %58 : vector<4x256xi1>, vector<4x256xf32>
    %c32 = arith.constant 32 : index
    %c0_36 = arith.constant 0 : index
    %63 = vector.load %arg7[%c32, %c0_36] : memref<36x256xf32, #tpu.memory_space<vmem>>, vector<4x256xf32>
    tpu.vector_store %arg7[%c32, %c0_36], %62 {strides = array<i32>} : memref<36x256xf32, #tpu.memory_space<vmem>>, vector<4x256xf32>,
    %c0_37 = arith.constant 0 : index
    %c0_38 = arith.constant 0 : index
    %64 = vector.load %arg7[%c0_37, %c0_38] : memref<36x256xf32, #tpu.memory_space<vmem>>, vector<36x256xf32>
    %cst_39 = arith.constant dense<0.000000e+00> : vector<4x256xf32>
    %65 = tpu.matmul %7, %64, %cst_39 {dimension_numbers = #tpu.dot_dimension_numbers<[1], [0], [0], [1], [0, 0, 1, 1], [], []>} : vector<4x36xf32>, vector<36x256xf32>, vector<4x256xf32> -> vector<4x256xf32>
    %66 = vector.broadcast %9 : vector<4x1xf32> to vector<4x256xf32>
    %67 = arith.addf %65, %66 : vector<4x256xf32>
    %cst_40 = arith.constant 0.000000e+00 : f32
    %68 = vector.broadcast %cst_40 : f32 to vector<4x256xf32>
    %69 = arith.maximumf %67, %68 : vector<4x256xf32>
    %70 = arith.addf %1, %69 : vector<4x256xf32>
    %c0_41 = arith.constant 0 : index
    %c0_42 = arith.constant 0 : index
    %c0_43 = arith.constant 0 : index
    %71 = vector.load %arg6[%c0_41, %c0_42, %c0_43] : memref<1x4x256xf32, #tpu.memory_space<vmem>>, vector<1x4x256xf32>
    %72 = vector.shape_cast %71 : vector<1x4x256xf32> to vector<4x256xf32>
    %73 = vector.shape_cast %70 : vector<4x256xf32> to vector<1x4x256xf32>
    tpu.vector_store %arg6[%c0_41, %c0_42, %c0_43], %73 {strides = array<i32>} : memref<1x4x256xf32, #tpu.memory_space<vmem>>, vector<1x4x256xf32>,
    return
  }
  func.func @transform_0(%arg0: i32) -> (i32, i32, i32) {
    %c0_i32 = arith.constant 0 : i32
    %c0_i32_0 = arith.constant 0 : i32
    %c0_i32_1 = arith.constant 0 : i32
    return %arg0, %c0_i32, %c0_i32_0 : i32, i32, i32
  }
  func.func @transform_1(%arg0: i32) -> (i32, i32, i32) {
    %c0_i32 = arith.constant 0 : i32
    %c0_i32_0 = arith.constant 0 : i32
    %c0_i32_1 = arith.constant 0 : i32
    return %arg0, %c0_i32, %c0_i32_0 : i32, i32, i32
  }
  func.func @transform_2(%arg0: i32) -> (i32, i32, i32) {
    %c0_i32 = arith.constant 0 : i32
    %c0_i32_0 = arith.constant 0 : i32
    %c0_i32_1 = arith.constant 0 : i32
    return %arg0, %c0_i32, %c0_i32_0 : i32, i32, i32
  }
  func.func @transform_3(%arg0: i32) -> (i32, i32) {
    %c0_i32 = arith.constant 0 : i32
    %c0_i32_0 = arith.constant 0 : i32
    %c0_i32_1 = arith.constant 0 : i32
    return %c0_i32, %c0_i32_0 : i32, i32
  }
  func.func @transform_4(%arg0: i32) -> (i32, i32) {
    %c0_i32 = arith.constant 0 : i32
    %c0_i32_0 = arith.constant 0 : i32
    %c0_i32_1 = arith.constant 0 : i32
    return %c0_i32, %c0_i32_0 : i32, i32
  }
  func.func @transform_5(%arg0: i32) -> (i32, i32, i32) {
    %c0_i32 = arith.constant 0 : i32
    %c0_i32_0 = arith.constant 0 : i32
    %c0_i32_1 = arith.constant 0 : i32
    return %arg0, %c0_i32, %c0_i32_0 : i32, i32, i32
  }
}

</mosaic_0001>

<bundles_post_ra>
// kernel: mf_plain_encoder_single.1
= control target key start
LH: loop header
LB: loop body
LE: loop exit
PB: predicated region body
PF: predicated region fallthrough
CT: control target
= control target key end

     0   :  { %s784_s18 = smov 0   ;;  %s929_s0 = inlined_call_operand.vmem [shape: f32[2,4,256], index: 0, kind: input, shape index: {}]   ;;  %s930_s1 = inlined_call_operand.vmem [shape: f32[2,4,256], index: 1, kind: input, shape index: {}]   ;;  %s931_s2 = inlined_call_operand.vmem [shape: f32[2,4,256], index: 2, kind: input, shape index: {}]   ;;  %s932_s3 = inlined_call_operand.vmem [shape: f32[4,48], index: 3, kind: input, shape index: {}]   ;;  %s933_s4 = inlined_call_operand.vmem [shape: f32[4,2], index: 4, kind: input, shape index: {}]   ;;  %s934_s5 = inlined_call_operand.vmem [shape: f32[2,4,256], index: 5, kind: output, shape index: {}]  }
   0x1 LB: > { %s692_s19 = sadd.s32 4294967295, %s744_s18   ;;  %p696_p0 = scmp.ge.s32.totalorder %s744_s18, 1  ;;  %s744_s18 = sphi %s784_s18, %s15_s18  }
   0x2   : > { %p207_p1 = scmp.lt.s32.totalorder %s744_s18, 3 }
   0x4   : > { %p208_p2 = pnand %p696_p0, %p207_p1 }
   0x5   : > { %p245_p3 = scmp.lt.s32.totalorder (!%p208_p2), %s692_s19, 1  ;;  %s748_s9 = smov (!%p208_p2), 16  }
   0x6   : > { %211 = sbr.rel (%p208_p2) target bundleno = 686 (0x2ae), region = 40  ;;  %s749_s10 = smov (!%p208_p2), 112  }
   0x7   : > { %s750_s11 = smov (!%p208_p2), 1   ;;  %s751_s12 = smov (!%p208_p2), 127  }
   0x8   : > { %s753_s13 = smov (!%p208_p2), 116  }
   0xb   : > { %v746_v0 = vmov 0.0   ;;  %v795_v1 = vld [vmem:[%s933_s4] sm:$0xf]  ;;  %s944_s19 = smov (!%p245_p3, %s692_s19), 1  ;;  %v747_v2 = vmov 0   ;;  %vm278_vm0 = vcmask 1043456   ;;  %v365_v17 = vlaneseq }
   0xc   : > { %358 = vmatprep.mubr.f32.mxu0 %v746_v0  ;;  %598 = vmatprep.mubr.f32.mxu1 %v746_v0  ;;  %s798_s22 = sshll.u32 %s944_s19, 3  ;;  %v824_v11 = vld [vmem:[%s932_s3] sm:$0xf]  ;;  %vm286_vm1 = vcmask 97280   ;;  %v752_v56 = vmov 1   ;;  %vm525_vm11 = vcmask 293888  }
   0xd   : > { %733 = vset.pattern.permute.xlu0 %v747_v2  ;;  %s259_s25 = scalar_lea.vmem %s931_s2, %s798_s22  ;;  %s249_s28 = scalar_lea.vmem %s929_s0, %s798_s22  ;;  %v831_v18 = vand.u32 127, %v365_v17 }
   0xe   : > { %283 = vperm.xlu0 %733, %v795_v1   ;;  %v267_v3 = vld [vmem:[%s259_s25] sm:$0xff]  ;;  %s254_s6 = scalar_lea.vmem %s930_s1, %s798_s22  ;;  %s264_s16 = scalar_lea.vmem %s934_s5, %s798_s22 }
   0xf   : > { %v812_v4 = vld [vmem:[%s249_s28] sm:$0xff]  ;;  %v277_v5 = vcombine.high %v267_v3, %v267_v3  ;;  %vm396_vm2 = vcmp.lt.s32.totalorder %v831_v18, 16  ;;  %v367_v20 = vadd.s32 128, %v831_v18  ;;  %vm410_vm3 = vcmp.lt.s32.totalorder %v831_v18, 112 }
  0x10   : > { %v266_v6 = vld [vmem:[%s254_s6] sm:$0xff]  ;;  %v271_v7 = vcombine.high %v812_v4, %v812_v4  ;;  %v372_v35 = vand.u32 15, %v831_v18  ;;  %vm421_vm5 = vcmp.lt.s32.totalorder %v831_v18, 1  ;;  %vm428_vm6 = vcmp.lt.s32.totalorder %v831_v18, 127 }
  0x11   : > { %v274_v8 = vcombine.low %v266_v6, %v266_v6  ;;  %705 = vmatprep.subr.msk.mxu0 %vm278_vm0, %v277_v5  ;;  %vm399_vm4 = vcmp.ge.s32.totalorder %v367_v20, 240  ;;  %v379_v33 = vand.u32 15, %v367_v20 }
  0x12   : > { %v280_v9 = vsel %vm278_vm0, %v271_v7, %v266_v6  ;;  %706 = vmatpush1.msk.msra.mxu0 %vm278_vm0, %v267_v3  ;;  %vm849_vm7 = vcmp.eq.s32.totalorder %v372_v35, 0  ;;  %vm857_vm9 = vcmp.eq.s32.totalorder %v372_v35, 15  ;;  %734 = vset.pattern.permute.xlu0 %v752_v56 }
  0x13   : > { %v279_v10 = vsel %vm278_vm0, %v812_v4, %v274_v8  ;;  %324 = vmatprep.subr.mxu0 %v280_v9  ;;  %vm853_vm8 = vcmp.eq.s32.totalorder %v379_v33, 0  ;;  %vm861_vm10 = vcmp.eq.s32.totalorder %v379_v33, 15 }
  0x14   : > { %325 = vmatpush1.msra.mxu0 %v279_v10 }
  0x15   : > { %707 = vmatmul.mubr.msk.f32.vlgmr.msra.gmra.mxu0 %vm286_vm1, %v824_v11 }
  0x89   : > { %v284_v12 = vpop.permute.xlu0 %283 }
  0xd5   : > { %v360_v13 = vpop.f32.mrf.mxu0 }
  0xd6   : > { %v361_v14 = vadd.f32 %v360_v13, %v284_v12 }
  0xd7   : > { %v362_v15 = vpop.f32.mrf.mxu0 }
  0xd8   : > { %469 = vst [vmem:[#allocation2 + $0x48] sm:$0xf] %v361_v14  ;;  %v363_v16 = vadd.f32 %v362_v15, %v284_v12  ;;  %400 = vrot.lane.b32.xlu0 %v361_v14, %s748_s9 }
  0xda   : > { %470 = vst [vmem:[#allocation2 + $0x28] sm:$0xf] %v363_v16  ;;  %402 = vrot.lane.b32.xlu1 %v363_v16, %s748_s9 }
  0xdc   : > { %408 = vrot.lane.b32.xlu0 %v363_v16, %s749_s10 }
  0xde   : > { %406 = vrot.lane.b32.xlu1 %v361_v14, %s749_s10 }
  0xe0   : > { %449 = vrot.lane.b32.xlu0 %v363_v16, %s750_s11 }
  0xe2   : > { %447 = vrot.lane.b32.xlu1 %v361_v14, %s750_s11 }
  0xe4   : > { %455 = vrot.lane.b32.xlu0 %v363_v16, %s751_s12 }
  0xe6   : > { %453 = vrot.lane.b32.xlu1 %v361_v14, %s751_s12 }
 0x14a   : > { %v401_v19 = vpop.permute.xlu0 %400 }
 0x14c   : > { %v403_v21 = vpop.permute.xlu1 %402 }
 0x14d   : > { %v404_v22 = vsel %vm396_vm2, %v401_v19, %v403_v21  ;;  %v405_v26 = vsel %vm396_vm2, %v403_v21, %v401_v19 }
 0x14e   : > { %v438_v23 = vrot.slane %v404_v22, 4  ;;  %v409_v24 = vpop.permute.xlu0 %408 }
 0x150   : > { %442 = vst [vmem:[#allocation2] sm:$0xf0] %v438_v23  ;;  %v407_v25 = vpop.permute.xlu1 %406 }
 0x151   : > { %v411_v27 = vsel %vm410_vm3, %v407_v25, %v409_v24  ;;  %v412_v28 = vsel %vm410_vm3, %v409_v24, %v407_v25 }
 0x152   : > { %v499_v29 = vrot.slane %v411_v27, 4  ;;  %481 = vrot.lane.b32.xlu1 %v411_v27, %s750_s11  ;;  %v450_v30 = vpop.permute.xlu0 %449  ;;  %v416_v31 = vsel %vm399_vm4, %v404_v22, %v412_v28  ;;  %v413_v32 = vsel %vm396_vm2, %v411_v27, %v405_v26 }
 0x153   : > { %483 = vrot.lane.b32.xlu0 %v416_v31, %s750_s11  ;;  %v500_v34 = vrot.slane %v416_v31, 4  ;;  %v437_v36 = vrot.slane %v413_v32, 4 }
 0x154   : > { %503 = vst [vmem:[#allocation2 + $0x8] sm:$0xf0] %v499_v29  ;;  %v448_v37 = vpop.permute.xlu1 %447 }
 0x155   : > { %504 = vst [vmem:[#allocation2 + $0x20] sm:$0xf0] %v500_v34  ;;  %441 = vst [vmem:[#allocation2 + $0x30] sm:$0xf0] %v437_v36  ;;  %v451_v44 = vsel %vm421_vm5, %v448_v37, %v450_v30  ;;  %v452_v45 = vsel %vm421_vm5, %v450_v30, %v448_v37 }
 0x156   : > { %487 = vrot.lane.b32.xlu1 %v411_v27, %s751_s12  ;;  %v456_v42 = vpop.permute.xlu0 %455 }
 0x157   : > { %489 = vrot.lane.b32.xlu0 %v416_v31, %s751_s12 }
 0x158   : > { %v454_v43 = vpop.permute.xlu1 %453 }
 0x159   : > { %v457_v46 = vsel %vm428_vm6, %v454_v43, %v456_v42  ;;  %v458_v47 = vsel %vm428_vm6, %v456_v42, %v454_v43 }
 0x15a   : > { %v459_v48 = vsel %vm849_vm7, %v457_v46, %v452_v45  ;;  %v460_v49 = vsel %vm853_vm8, %v458_v47, %v451_v44  ;;  %v471_v50 = vsel %vm857_vm9, %v452_v45, %v457_v46  ;;  %v472_v51 = vsel %vm861_vm10, %v451_v44, %v458_v47  ;;  %417 = vrot.lane.b32.xlu1 %v413_v32, %s750_s11 }
 0x15b   : > { %v463_v52 = vrot.slane %v459_v48, 4  ;;  %v464_v53 = vrot.slane %v460_v49, 4  ;;  %v475_v54 = vrot.slane %v471_v50, 4  ;;  %v476_v55 = vrot.slane %v472_v51, 4  ;;  %419 = vrot.lane.b32.xlu0 %v404_v22, %s750_s11 }
 0x15d   : > { %467 = vst [vmem:[#allocation2 + $0x18] sm:$0xf0] %v463_v52  ;;  %468 = vst [vmem:[#allocation2 + $0x10] sm:$0xf0] %v464_v53 }
 0x15e   : > { %479 = vst [vmem:[#allocation2 + $0x48] sm:$0xf0] %v475_v54  ;;  %480 = vst [vmem:[#allocation2 + $0x28] sm:$0xf0] %v476_v55  ;;  %424 = vrot.lane.b32.xlu1 %v413_v32, %s751_s12 }
 0x15f   : > { %426 = vrot.lane.b32.xlu0 %v404_v22, %s751_s12 }
 0x162   : > { %523 = vrot.lane.b32.xlu1 %v824_v11, %s753_s13 }
 0x163   : > { %520 = vperm.xlu0 %734, %v795_v1  }
 0x165   : > { %v514_v22 = vld [vmem:[#allocation2 + $0x28] sm:$0xff] }
 0x166   : > { %v513_v23 = vld [vmem:[#allocation2 + $0x48] sm:$0xff] }
 0x1c4   : > { %v482_v57 = vpop.permute.xlu1 %481 }
 0x1c5   : > { %v484_v58 = vpop.permute.xlu0 %483 }
 0x1c6   : > { %v485_v61 = vsel %vm421_vm5, %v482_v57, %v484_v58  ;;  %v486_v62 = vsel %vm421_vm5, %v484_v58, %v482_v57 }
 0x1c8   : > { %v488_v59 = vpop.permute.xlu1 %487 }
 0x1c9   : > { %v490_v60 = vpop.permute.xlu0 %489 }
 0x1ca   : > { %v491_v63 = vsel %vm428_vm6, %v488_v59, %v490_v60  ;;  %v492_v0 = vsel %vm428_vm6, %v490_v60, %v488_v59 }
 0x1cb   : > { %v493_v2 = vsel %vm849_vm7, %v491_v63, %v486_v62  ;;  %v494_v1 = vsel %vm853_vm8, %v492_v0, %v485_v61  ;;  %v505_v3 = vsel %vm857_vm9, %v486_v62, %v491_v63  ;;  %v506_v5 = vsel %vm861_vm10, %v485_v61, %v492_v0 }
 0x1cc   : > { %495 = vst [vmem:[#allocation2 + $0x8] sm:$0xf] %v493_v2  ;;  %496 = vst [vmem:[#allocation2 + $0x20] sm:$0xf] %v494_v1  ;;  %v418_v6 = vpop.permute.xlu1 %417 }
 0x1cd   : > { %507 = vst [vmem:[#allocation2 + $0x40] sm:$0xf] %v505_v3  ;;  %508 = vst [vmem:[#allocation2 + $0x38] sm:$0xf] %v506_v5  ;;  %v420_v7 = vpop.permute.xlu0 %419 }
 0x1ce   : > { %v422_v10 = vsel %vm421_vm5, %v418_v6, %v420_v7  ;;  %v423_v11 = vsel %vm421_vm5, %v420_v7, %v418_v6 }
 0x1d0   : > { %v425_v8 = vpop.permute.xlu1 %424 }
 0x1d1   : > { %v427_v9 = vpop.permute.xlu0 %426 }
 0x1d2   : > { %v429_v12 = vsel %vm428_vm6, %v425_v8, %v427_v9  ;;  %v430_v13 = vsel %vm428_vm6, %v427_v9, %v425_v8 }
 0x1d3   : > { %v431_v14 = vsel %vm849_vm7, %v429_v12, %v423_v11  ;;  %v432_v15 = vsel %vm853_vm8, %v430_v13, %v422_v10  ;;  %v443_v16 = vsel %vm857_vm9, %v423_v11, %v429_v12  ;;  %v444_v17 = vsel %vm861_vm10, %v422_v10, %v430_v13  ;;  %v516_v18 = vld [vmem:[#allocation2 + $0x20] sm:$0xff]  ;;  %v515_v21 = vld [vmem:[#allocation2 + $0x8] sm:$0xff] }
 0x1d4   : > { %v518_v19 = vld [vmem:[#allocation2 + $0x38] sm:$0xf]  ;;  %v517_v20 = vld [vmem:[#allocation2 + $0x40] sm:$0xf]  ;;  %433 = vst [vmem:[#allocation2 + $0x30] sm:$0xf] %v431_v14  ;;  %v524_v27 = vpop.permute.xlu1 %523 }
 0x1d5   : > { %434 = vst [vmem:[#allocation2] sm:$0xf] %v432_v15  ;;  %445 = vst [vmem:[#allocation2 + $0x18] sm:$0xf] %v443_v16  ;;  %708 = vmatprep.subr.msk.mxu1 %vm278_vm0, %v518_v19 }
 0x1d6   : > { %446 = vst [vmem:[#allocation2 + $0x10] sm:$0xf] %v444_v17  ;;  %709 = vmatpush1.msk.msra.mxu1 %vm278_vm0, %v517_v20 }
 0x1d7   : > { %558 = vmatprep.subr.mxu1 %v516_v18 }
 0x1d8   : > { %559 = vmatpush1.msra.mxu1 %v515_v21 }
 0x1d9   : > { %560 = vmatprep.subr.mxu1 %v514_v22 }
 0x1da   : > { %561 = vmatpush1.msra.mxu1 %v513_v23 }
 0x1db   : > { %v509_v28 = vld [vmem:[#allocation2 + $0x30] sm:$0xff] }
 0x1dc   : > { %v511_v25 = vld [vmem:[#allocation2 + $0x18] sm:$0xff]  ;;  %v510_v26 = vld [vmem:[#allocation2] sm:$0xff] }
 0x1dd   : > { %v512_v24 = vld [vmem:[#allocation2 + $0x10] sm:$0xff] }
 0x1de   : > { %562 = vmatprep.subr.mxu1 %v512_v24  ;;  %v521_v29 = vpop.permute.xlu0 %520 }
 0x1df   : > { %563 = vmatpush1.msra.mxu1 %v511_v25 }
 0x1e0   : > { %564 = vmatprep.subr.mxu1 %v510_v26 }
 0x1e1   : > { %565 = vmatpush1.msra.mxu1 %v509_v28 }
 0x1e2   : > { %710 = vmatmul.mubr.msk.f32.vlgmr.msra.gmra.mxu1 %vm525_vm11, %v524_v27 }
 0x2a2   : > { %v600_v30 = vpop.f32.mrf.mxu1 }
 0x2a3   : > { %v601_v31 = vadd.f32 %v600_v30, %v521_v29 }
 0x2a4   : > { %v602_v32 = vpop.f32.mrf.mxu1 }
 0x2a5   : > { %v603_v33 = vadd.f32 %v602_v32, %v521_v29  ;;  %v605_v34 = vmax.f32 %v601_v31, 0.0 }
 0x2a7   : > { %v606_v35 = vmax.f32 %v603_v33, 0.0 }
 0x2a9   : > { %v609_v36 = vcombine.low %v605_v34, %v606_v35 }
 0x2ab   : > { %v611_v37 = vadd.f32 %v609_v36, %v812_v4 }
 0x2ad   : > { %612 = vst [vmem:[%s264_s16] sm:$0xff] %v611_v37 }
 0x2ae PF: > { %s15_s18 = sadd.s32 1, %s744_s18  }
 0x2af   : > { %p12_p4 = scmp.ge.s32.totalorder %s15_s18, 4  }
 0x2b1   :  { %14 = sbr.rel (!%p12_p4) target bundleno = 1 (0x1), region = 76 }

</bundles_post_ra>
